<compile_context>
chip_gen: v5e
topology: v5e:2x2
jax: 0.10.0
libtpu: 0.0.40
codegen_flags: <defaults>
</compile_context>

<pallas_src>
import jax
import jax.numpy as jnp
from jax.experimental import pallas as pl
from jax.experimental.pallas import tpu as pltpu

_LANES = 512  # lane-dense last dim (multiple of 128) -> unmasked full vld/vst


def _h_sigmoid_kernel(x_ref, o_ref):
    # ReLU6(x + 3) / 6  ==  clip(x + 3, 0, 6) / 6   -- VPU only.
    x = x_ref[...]
    o_ref[...] = (jnp.clip(x + 3.0, 0.0, 6.0) / 6.0).astype(o_ref.dtype)


def _round_up(x, m):
    return -(-x // m) * m


def _chip_params():
    """Per-generation (block bytes, scoped-VMEM limit, #TensorCores)."""
    vmem_cap = 128 * 1024 * 1024
    try:
        info = pltpu.get_tpu_info()
        vmem_cap = int(getattr(info, "vmem_capacity_bytes", vmem_cap))
    except Exception:
        pass
    if vmem_cap <= 64 * 1024 * 1024:
        # v7x-class: fast HBM, small (64 MiB) VMEM, 2 TensorCores per chip.
        # 8 MiB blocks: 2 streams x 2 buffers x 8 MiB = 32 MiB double-buffering.
        return 8 * 1024 * 1024, 40 * 1024 * 1024, 2
    # v5e / v6e class: 128 MiB physical VMEM, 1 TensorCore.
    # 4 MiB blocks; explicitly raise the scoped limit so v5e (16 MiB default
    # scoped) does not OOM.
    return 4 * 1024 * 1024, 32 * 1024 * 1024, 1


def h_sigmoid(x, *, block_rows=None):
    """Elementwise h_sigmoid on an array of any shape/dtype.

    `block_rows` (optional) overrides the auto per-generation block size
    (mainly useful for exercising the multi-block / ragged-edge path on
    small test inputs).
    """
    orig_shape = x.shape
    dtype = x.dtype
    n = x.size
    if n == 0:
        return x

    itemsize = jnp.dtype(dtype).itemsize
    # Sublane packing: f32 -> 8 rows, bf16/f16 -> 16, int8/fp8 -> 32.
    sub = 8 * max(1, 4 // itemsize)

    cols = _LANES
    rows = -(-n // cols)  # ceil(n / cols)

    block_bytes, vmem_limit, n_cores = _chip_params()
    if block_rows is None:
        max_block_rows = max(sub, (block_bytes // (cols * itemsize)) // sub * sub)
    else:
        max_block_rows = max(sub, _round_up(int(block_rows), sub))

    total_bytes = n * itemsize

    if rows <= sub:
        # Tiny input: one block covering the full array (full-extent dims are
        # always legal, even when not a multiple of the sublane packing).
        blk = rows
        grid_rows = 1
    else:
        target_grid = -(-rows // max_block_rows)  # cdiv
        if n_cores >= 2 and total_bytes > (1 << 20):
            # v7x: >= 2 (even) grid steps so "parallel" shards over both TCs
            # with no 1-block load imbalance.
            target_grid = max(target_grid, 2)
            if target_grid % 2:
                target_grid += 1
        blk = min(rows, _round_up(-(-rows // target_grid), sub))
        grid_rows = -(-rows // blk)  # ragged last block handled by masking

    # Only pad the flat tail to a multiple of `cols` (< cols elements); when
    # n % cols == 0 this path is a free reshape (no extra HBM pass).
    padded = rows * cols
    flat = x.reshape(-1)
    needs_pad = padded != n
    if needs_pad:
        flat = jnp.pad(flat, (0, padded - n))
    x2 = flat.reshape(rows, cols)

    out2 = pl.pallas_call(
        _h_sigmoid_kernel,
        out_shape=jax.ShapeDtypeStruct((rows, cols), dtype),
        grid=(grid_rows,),
        in_specs=[pl.BlockSpec((blk, cols), lambda i: (i, 0))],
        out_specs=pl.BlockSpec((blk, cols), lambda i: (i, 0)),
        compiler_params=pltpu.CompilerParams(
            dimension_semantics=("parallel",),  # megacore / v7x 2-TC sharding
            vmem_limit_bytes=vmem_limit,
        ),
        cost_estimate=pl.CostEstimate(
            flops=3 * padded,              # add, clip, div per element
            transcendentals=0,
            bytes_accessed=2 * padded * itemsize,
        ),
    )(x2)

    out_flat = out2.reshape(-1)
    if needs_pad:
        # Drop h_sigmoid(0) = 0.5 written into the (tiny) pad region.
        out_flat = out_flat[:n]
    return out_flat.reshape(orig_shape)


if __name__ == "__main__":
    key = jax.random.PRNGKey(0)
    k1, k2, k3 = jax.random.split(key, 3)

    # (N, C, H, W) activations, as h_sigmoid is used inside the attention block.
    # Scaled so values hit both ReLU6 saturation regions (x+3 < 0 and > 6).
    x = jax.random.normal(k1, (2, 4, 16, 16), dtype=jnp.float32) * 4.0
    out = jax.block_until_ready(h_sigmoid(x))
    ref = jnp.clip(x + 3.0, 0.0, 6.0) / 6.0
    assert out.shape == x.shape and out.dtype == x.dtype
    assert jnp.allclose(out, ref, atol=1e-6, rtol=1e-6), "f32 mismatch vs reference"

    # Ragged-tail + multi-block path: small forced block_rows exercises the
    # lane-tail pad and Pallas' masked write on the ragged last row-block.
    x2 = jax.random.normal(k2, (16899,), dtype=jnp.float32) * 4.0
    out2 = jax.block_until_ready(h_sigmoid(x2, block_rows=8))
    ref2 = jnp.clip(x2 + 3.0, 0.0, 6.0) / 6.0
    assert out2.shape == x2.shape
    assert jnp.allclose(out2, ref2, atol=1e-6, rtol=1e-6), "ragged-path mismatch"

    # bf16 stays bf16 end-to-end (half the HBM bytes on a mem-bound op).
    x3 = (jax.random.normal(k3, (2, 4, 16, 16), dtype=jnp.float32) * 4.0).astype(jnp.bfloat16)
    out3 = jax.block_until_ready(h_sigmoid(x3))
    ref3 = jnp.clip(x3 + 3.0, 0.0, 6.0) / 6.0
    assert out3.dtype == jnp.bfloat16
    assert jnp.allclose(out3.astype(jnp.float32), ref3.astype(jnp.float32),
                        atol=2e-2, rtol=2e-2), "bf16 mismatch vs reference"

    print("KERNEL_OK")
</pallas_src>

<mosaic_0001>
module attributes {stable_mosaic.version = 11 : i64} {
  func.func @_h_sigmoid_kernel(%arg0: i32, %arg1: memref<4x512xf32, #tpu.memory_space<vmem>>, %arg2: memref<4x512xf32, #tpu.memory_space<vmem>>) attributes {dimension_semantics = [#tpu.dimension_semantics<parallel>], iteration_bounds = array<i64: 1>, scalar_prefetch = 0 : i64, scratch_operands = 0 : i64, tpu.core_type = #tpu.core_type<tc>, window_params = [{transform_indices = @transform_0, window_bounds = array<i64: 4, 512>}, {transform_indices = @transform_1, window_bounds = array<i64: 4, 512>}]} {
    %c0 = arith.constant 0 : index
    %c0_0 = arith.constant 0 : index
    %0 = vector.load %arg1[%c0, %c0_0] : memref<4x512xf32, #tpu.memory_space<vmem>>, vector<4x512xf32>
    %cst = arith.constant 3.000000e+00 : f32
    %1 = vector.broadcast %cst : f32 to vector<4x512xf32>
    %2 = arith.addf %0, %1 : vector<4x512xf32>
    %cst_1 = arith.constant 0.000000e+00 : f32
    %cst_2 = arith.constant 6.000000e+00 : f32
    %3 = vector.broadcast %cst_1 : f32 to vector<4x512xf32>
    %4 = arith.maximumf %3, %2 : vector<4x512xf32>
    %5 = vector.broadcast %cst_2 : f32 to vector<4x512xf32>
    %6 = arith.minimumf %5, %4 : vector<4x512xf32>
    %cst_3 = arith.constant 6.000000e+00 : f32
    %7 = vector.broadcast %cst_3 : f32 to vector<4x512xf32>
    %8 = arith.divf %6, %7 : vector<4x512xf32>
    %c0_4 = arith.constant 0 : index
    %c0_5 = arith.constant 0 : index
    %9 = vector.load %arg2[%c0_4, %c0_5] : memref<4x512xf32, #tpu.memory_space<vmem>>, vector<4x512xf32>
    tpu.vector_store %arg2[%c0_4, %c0_5], %8 {strides = array<i32>} : memref<4x512xf32, #tpu.memory_space<vmem>>, vector<4x512xf32>,
    return
  }
  func.func @transform_0(%arg0: i32) -> (i32, i32) {
    %c0_i32 = arith.constant 0 : i32
    %c0_i32_0 = arith.constant 0 : i32
    return %arg0, %c0_i32 : i32, i32
  }
  func.func @transform_1(%arg0: i32) -> (i32, i32) {
    %c0_i32 = arith.constant 0 : i32
    %c0_i32_0 = arith.constant 0 : i32
    return %arg0, %c0_i32 : i32, i32
  }
}

</mosaic_0001>

<bundles_post_ra>
// kernel: tpu_custom_call.1
= control target key start
LH: loop header
LB: loop body
LE: loop exit
PB: predicated region body
PF: predicated region fallthrough
CT: control target
= control target key end

     0   :  { %6 = vsyncpa [#allocation3], 0  ;;  %s135_s0 = inlined_call_operand.hbm [shape: f32[4,512], index: 0, kind: input, shape index: {}]   ;;  %s136_s1 = inlined_call_operand.hbm [shape: f32[4,512], index: 1, kind: output, shape index: {}]  }
   0x1   :  { %7 = vsyncpa [#allocation4], 0  ;;  %s13_s8 = sshll.u32 %s135_s0, 4  ;;  %s116_s9 = smov [#allocation2]   ;;  %s14_s8 = int_to_ptr.hbm [resolvable:$true] %s13_s8 }
   0x2   :  { %s15_s10 = sshll.u32 %s116_s9, 4  ;;  %s16_s10 = int_to_ptr.vmem [resolvable:$true] %s15_s10 }
   0x3   :  { %18 = dma.hbm_to_vmem [thread:$0]  %s14_s8, 256, %s16_s10, [#allocation3]  }
   0x4   :  { %112 = dma.done.wait [#allocation3], 256  }
   0x5   :  { %113 = vsyncadd [#allocation3], 4294967040  ;;  %v117_v0 = vmov 6.0   ;;  %v23_v2 = vld [vmem:[#allocation2] sm:$0xff]  ;;  %v24_v3 = vld [vmem:[#allocation2 + $0x8] sm:$0xff]  ;;  %s118_s0 = smov [#allocation5]  }
   0x6   :  { %62 = vrcp.f32 %v117_v0  ;;  %v25_v4 = vadd.f32 3.0, %v23_v2  ;;  %v26_v6 = vadd.f32 3.0, %v24_v3  ;;  %s47_s11 = sshll.u32 %s118_s0, 4  ;;  %s49_s14 = sshll.u32 %s136_s1, 4  ;;  %s48_s11 = int_to_ptr.vmem [resolvable:$true] %s47_s11  ;;  %s50_s14 = int_to_ptr.hbm [resolvable:$true] %s49_s14 }
   0x8   :  { %v27_v7 = vmax.f32 %v25_v4, 0.0  ;;  %v28_v9 = vmax.f32 %v26_v6, 0.0 }
   0xa   :  { %v29_v11 = vmin.f32 %v27_v7, 6.0  ;;  %v30_v12 = vmin.f32 %v28_v9, 6.0 }
   0xc   :  { %v63_v1 = vpop.eup %62 }
   0xd   :  { %v32_v5 = vmul.f32 6.0, %v63_v1  ;;  %vm36_vm0 = vweird.f32 %v63_v1 }
   0xf   :  { %v33_v8 = vsub.f32 1.0, %v32_v5 }
  0x11   :  { %v34_v10 = vmul.f32 %v63_v1, %v33_v8 }
  0x13   :  { %v35_v13 = vadd.f32 %v63_v1, %v34_v10 }
  0x15   :  { %v37_v14 = vsel %vm36_vm0, %v63_v1, %v35_v13 }
  0x16   :  { %v38_v15 = vmul.f32 %v37_v14, %v29_v11  ;;  %v39_v16 = vmul.f32 %v37_v14, %v30_v12 }
  0x18   :  { %40 = vst [vmem:[#allocation5] sm:$0xff] %v38_v15 }
  0x19   :  { %41 = vst [vmem:[#allocation5 + $0x8] sm:$0xff] %v39_v16 }
  0x1a   :  { %52 = dma.vmem_to_hbm [thread:$0]  %s48_s11, 256, %s50_s14, [#allocation4]  }
  0x1b   :  { %114 = dma.done.wait [#allocation4], 256  }
  0x1c   :  { %115 = vsyncadd [#allocation4], 4294967040 }
  0x1d   :  { %57 = vsyncpa [#allocation3], 1 }
  0x1e   :  { %58 = vsyncpa [#allocation4], 1 }

</bundles_post_ra>
